<compile_context>
chip_gen: v7x
topology: tpu7x:2x2x1
jax: 0.10.0
libtpu: 0.0.40
codegen_flags: <defaults>
</compile_context>

<pallas_src>
import jax
import jax.numpy as jnp
from jax.experimental import pallas as pl
from jax.experimental.pallas import tpu as pltpu

LANE = 128
SUBLANE = 8


def _round_down_multiple(x, m):
    return max(m, (x // m) * m)


def mlp_kernel(x_ref, w1_ref, b1_ref, w2_ref, b2_ref, w3_ref, b3_ref,
               wo_ref, bo_ref, o_ref):
    # x_ref: (TB, F) f32   w*_ref: (in, out) bf16   b*_ref: (1, out) f32
    # o_ref: (TB, OUT) f32 (true output width, no lane padding)
    # All matmuls hit the MXU with bf16 operands + f32 accumulation; the
    # elementwise bias/ReLU work stays f32 on the VPU.
    x = x_ref[...].astype(jnp.bfloat16)

    h = jnp.dot(x, w1_ref[...], preferred_element_type=jnp.float32) + b1_ref[...]
    h = jnp.maximum(h, 0.0)

    h = jnp.dot(h.astype(jnp.bfloat16), w2_ref[...],
                preferred_element_type=jnp.float32) + b2_ref[...]
    h = jnp.maximum(h, 0.0)

    h = jnp.dot(h.astype(jnp.bfloat16), w3_ref[...],
                preferred_element_type=jnp.float32) + b3_ref[...]
    h = jnp.maximum(h, 0.0)

    out = jnp.dot(h.astype(jnp.bfloat16), wo_ref[...],
                  preferred_element_type=jnp.float32) + bo_ref[...]
    o_ref[...] = out.astype(o_ref.dtype)


def prepare_params(params):
    """One-time prep: cast weights to bf16 (MXU operands), keep biases f32.
    No output-layer padding anymore (true-width output writeback)."""
    return [(w.astype(jnp.bfloat16), b.astype(jnp.float32)) for w, b in params]


def _pick_batch_tile(batch, flatten_dim, batch_tile):
    """Choose rows-per-grid-step.

    - Large batch: big tiles (default 2048) amortize the ~0.35us per-step cost,
      capped so the multi-buffered x tile stays well under the default scoped
      VMEM limit on every generation (v5e/v6e/v7x).
    - Small batch: split into 2 sublane-aligned tiles when possible so both
      v7x TensorCores get a grid step; otherwise a single full-batch tile
      (block dim == full array dim is always layout-legal).
    """
    vmem_cap_rows = _round_down_multiple(
        (4 << 20) // (4 * max(flatten_dim, LANE)), SUBLANE)
    tile = _round_down_multiple(min(batch_tile, vmem_cap_rows), SUBLANE)
    if batch > tile:
        return tile  # >= 2 grid steps; ragged tail handled by block masking
    half = batch // 2
    if half >= SUBLANE and half % SUBLANE == 0:
        return half  # exactly 2 grid steps, no padding needed
    return batch


def mlp_forward(x, prepped_params, *, seq_len, pred_len, input_dim,
                batch_tile=2048):
    """x: (batch, seq_len, input_dim) -> (batch, pred_len, input_dim)."""
    batch = x.shape[0]
    flatten_dim = seq_len * input_dim
    out_dim = pred_len * input_dim

    # Contiguous metadata reshape only -- no wrapper-side pad or slice copies.
    x2d = x.reshape(batch, flatten_dim)

    (w1, b1), (w2, b2), (w3, b3), (wo, bo) = prepped_params
    h1, h2, h3 = w1.shape[1], w2.shape[1], w3.shape[1]

    tb = _pick_batch_tile(batch, flatten_dim, batch_tile)
    num_steps = pl.cdiv(batch, tb)
    grid = (num_steps,)

    def const_spec(shape):
        # Constant block index -> DMA'd once, stays VMEM-resident across tiles.
        return pl.BlockSpec(shape, lambda i: (0, 0))

    def act_spec(shape):
        # Deeper pipelining on the streamed activation tile when the grid is
        # long enough for it to matter; guarded for older JAX without
        # pipeline_mode / pl.Buffered.
        if num_steps >= 3 and hasattr(pl, "Buffered"):
            try:
                return pl.BlockSpec(shape, lambda i: (i, 0),
                                    pipeline_mode=pl.Buffered(3))
            except (TypeError, AttributeError):
                pass
        return pl.BlockSpec(shape, lambda i: (i, 0))

    flops = 2 * batch * (flatten_dim * h1 + h1 * h2 + h2 * h3 + h3 * out_dim)
    bytes_accessed = (
        x2d.size * x2d.dtype.itemsize
        + sum(w.size * w.dtype.itemsize + b.size * b.dtype.itemsize
              for w, b in prepped_params)
        + batch * out_dim * 4)

    out = pl.pallas_call(
        mlp_kernel,
        out_shape=jax.ShapeDtypeStruct((batch, out_dim), jnp.float32),
        grid=grid,
        in_specs=[
            act_spec((tb, flatten_dim)),
            const_spec(w1.shape), const_spec(b1.shape),
            const_spec(w2.shape), const_spec(b2.shape),
            const_spec(w3.shape), const_spec(b3.shape),
            const_spec(wo.shape), const_spec(bo.shape),
        ],
        out_specs=pl.BlockSpec((tb, out_dim), lambda i: (i, 0)),
        compiler_params=pltpu.CompilerParams(
            dimension_semantics=("parallel",)),
        cost_estimate=pl.CostEstimate(flops=flops, transcendentals=0,
                                      bytes_accessed=bytes_accessed),
    )(x2d, w1, b1, w2, b2, w3, b3, wo, bo)

    # Free contiguous reshape back to (batch, pred_len, input_dim).
    return out.reshape(batch, pred_len, input_dim)


def init_params(key, flatten_dim, hidden_dims, out_dim):
    """Deterministic init; Linear weights stored as (in, out), biases as (1, out)."""
    params = []
    in_dim = flatten_dim
    dims = list(hidden_dims) + [out_dim]
    for d in dims:
        key, kw, kb = jax.random.split(key, 3)
        bound = 1.0 / jnp.sqrt(in_dim)
        w = jax.random.uniform(kw, (in_dim, d), jnp.float32, -bound, bound)
        b = jax.random.uniform(kb, (1, d), jnp.float32, -bound, bound)
        params.append((w, b))
        in_dim = d
    return params


if __name__ == "__main__":
    # Small shapes consistent with the module's forward.
    batch, seq_len, pred_len, input_dim = 2, 8, 4, 4
    hidden_dims = [64, 128, 64]
    flatten_dim = seq_len * input_dim
    out_dim = pred_len * input_dim

    key = jax.random.PRNGKey(0)
    key, kx = jax.random.split(key)
    x = jax.random.normal(kx, (batch, seq_len, input_dim), jnp.float32)

    params = init_params(key, flatten_dim, hidden_dims, out_dim)
    kernel_params = prepare_params(params)

    y = mlp_forward(x, kernel_params,
                    seq_len=seq_len, pred_len=pred_len, input_dim=input_dim)
    y = jax.block_until_ready(y)

    # Reference check in plain JAX, f32, eval mode (dropout = identity).
    h = x.reshape(batch, -1)
    for i, (w, b) in enumerate(params):
        h = h @ w + b
        if i < len(params) - 1:
            h = jnp.maximum(h, 0.0)
    ref = h.reshape(batch, pred_len, input_dim)

    assert y.shape == (batch, pred_len, input_dim)
    # bf16 MXU operands (f32 accumulation) -> loosened tolerance vs pure-f32 ref.
    assert jnp.allclose(y, ref, atol=5e-2, rtol=5e-2), "mismatch vs reference"

    print("KERNEL_OK")
</pallas_src>

<mosaic_0001>
module attributes {stable_mosaic.version = 11 : i64} {
  func.func @mlp_kernel(%arg0: i32, %arg1: memref<2x32xf32, #tpu.memory_space<vmem>>, %arg2: memref<32x64xbf16, #tpu.memory_space<vmem>>, %arg3: memref<1x64xf32, #tpu.memory_space<vmem>>, %arg4: memref<64x128xbf16, #tpu.memory_space<vmem>>, %arg5: memref<1x128xf32, #tpu.memory_space<vmem>>, %arg6: memref<128x64xbf16, #tpu.memory_space<vmem>>, %arg7: memref<1x64xf32, #tpu.memory_space<vmem>>, %arg8: memref<64x16xbf16, #tpu.memory_space<vmem>>, %arg9: memref<1x16xf32, #tpu.memory_space<vmem>>, %arg10: memref<2x16xf32, #tpu.memory_space<vmem>>) attributes {dimension_semantics = [#tpu.dimension_semantics<parallel>], iteration_bounds = array<i64: 1>, scalar_prefetch = 0 : i64, scratch_operands = 0 : i64, tpu.core_type = #tpu.core_type<tc>, window_params = [{transform_indices = @transform_0, window_bounds = array<i64: 2, 32>}, {pipeline_mode = #tpu.pipeline_mode<synchronous>, transform_indices = @transform_1, window_bounds = array<i64: 32, 64>}, {pipeline_mode = #tpu.pipeline_mode<synchronous>, transform_indices = @transform_2, window_bounds = array<i64: 1, 64>}, {pipeline_mode = #tpu.pipeline_mode<synchronous>, transform_indices = @transform_3, window_bounds = array<i64: 64, 128>}, {pipeline_mode = #tpu.pipeline_mode<synchronous>, transform_indices = @transform_4, window_bounds = array<i64: 1, 128>}, {pipeline_mode = #tpu.pipeline_mode<synchronous>, transform_indices = @transform_5, window_bounds = array<i64: 128, 64>}, {pipeline_mode = #tpu.pipeline_mode<synchronous>, transform_indices = @transform_6, window_bounds = array<i64: 1, 64>}, {pipeline_mode = #tpu.pipeline_mode<synchronous>, transform_indices = @transform_7, window_bounds = array<i64: 64, 16>}, {pipeline_mode = #tpu.pipeline_mode<synchronous>, transform_indices = @transform_8, window_bounds = array<i64: 1, 16>}, {transform_indices = @transform_9, window_bounds = array<i64: 2, 16>}]} {
    %c0 = arith.constant 0 : index
    %c0_0 = arith.constant 0 : index
    %0 = vector.load %arg1[%c0, %c0_0] : memref<2x32xf32, #tpu.memory_space<vmem>>, vector<2x32xf32>
    %1 = arith.truncf %0 : vector<2x32xf32> to vector<2x32xbf16>
    %c0_1 = arith.constant 0 : index
    %c0_2 = arith.constant 0 : index
    %2 = vector.load %arg2[%c0_1, %c0_2] : memref<32x64xbf16, #tpu.memory_space<vmem>>, vector<32x64xbf16>
    %cst = arith.constant dense<0.000000e+00> : vector<2x64xf32>
    %3 = tpu.matmul %1, %2, %cst {dimension_numbers = #tpu.dot_dimension_numbers<[1], [0], [0], [1], [0, 0, 1, 1], [], []>} : vector<2x32xbf16>, vector<32x64xbf16>, vector<2x64xf32> -> vector<2x64xf32>
    %c0_3 = arith.constant 0 : index
    %c0_4 = arith.constant 0 : index
    %4 = vector.load %arg3[%c0_3, %c0_4] : memref<1x64xf32, #tpu.memory_space<vmem>>, vector<1x64xf32>
    %5 = vector.broadcast %4 : vector<1x64xf32> to vector<2x64xf32>
    %6 = arith.addf %3, %5 : vector<2x64xf32>
    %cst_5 = arith.constant 0.000000e+00 : f32
    %7 = vector.broadcast %cst_5 : f32 to vector<2x64xf32>
    %8 = arith.maximumf %6, %7 : vector<2x64xf32>
    %9 = arith.truncf %8 : vector<2x64xf32> to vector<2x64xbf16>
    %c0_6 = arith.constant 0 : index
    %c0_7 = arith.constant 0 : index
    %10 = vector.load %arg4[%c0_6, %c0_7] : memref<64x128xbf16, #tpu.memory_space<vmem>>, vector<64x128xbf16>
    %cst_8 = arith.constant dense<0.000000e+00> : vector<2x128xf32>
    %11 = tpu.matmul %9, %10, %cst_8 {dimension_numbers = #tpu.dot_dimension_numbers<[1], [0], [0], [1], [0, 0, 1, 1], [], []>} : vector<2x64xbf16>, vector<64x128xbf16>, vector<2x128xf32> -> vector<2x128xf32>
    %c0_9 = arith.constant 0 : index
    %c0_10 = arith.constant 0 : index
    %12 = vector.load %arg5[%c0_9, %c0_10] : memref<1x128xf32, #tpu.memory_space<vmem>>, vector<1x128xf32>
    %13 = vector.broadcast %12 : vector<1x128xf32> to vector<2x128xf32>
    %14 = arith.addf %11, %13 : vector<2x128xf32>
    %cst_11 = arith.constant 0.000000e+00 : f32
    %15 = vector.broadcast %cst_11 : f32 to vector<2x128xf32>
    %16 = arith.maximumf %14, %15 : vector<2x128xf32>
    %17 = arith.truncf %16 : vector<2x128xf32> to vector<2x128xbf16>
    %c0_12 = arith.constant 0 : index
    %c0_13 = arith.constant 0 : index
    %18 = vector.load %arg6[%c0_12, %c0_13] : memref<128x64xbf16, #tpu.memory_space<vmem>>, vector<128x64xbf16>
    %cst_14 = arith.constant dense<0.000000e+00> : vector<2x64xf32>
    %19 = tpu.matmul %17, %18, %cst_14 {dimension_numbers = #tpu.dot_dimension_numbers<[1], [0], [0], [1], [0, 0, 1, 1], [], []>} : vector<2x128xbf16>, vector<128x64xbf16>, vector<2x64xf32> -> vector<2x64xf32>
    %c0_15 = arith.constant 0 : index
    %c0_16 = arith.constant 0 : index
    %20 = vector.load %arg7[%c0_15, %c0_16] : memref<1x64xf32, #tpu.memory_space<vmem>>, vector<1x64xf32>
    %21 = vector.broadcast %20 : vector<1x64xf32> to vector<2x64xf32>
    %22 = arith.addf %19, %21 : vector<2x64xf32>
    %cst_17 = arith.constant 0.000000e+00 : f32
    %23 = vector.broadcast %cst_17 : f32 to vector<2x64xf32>
    %24 = arith.maximumf %22, %23 : vector<2x64xf32>
    %25 = arith.truncf %24 : vector<2x64xf32> to vector<2x64xbf16>
    %c0_18 = arith.constant 0 : index
    %c0_19 = arith.constant 0 : index
    %26 = vector.load %arg8[%c0_18, %c0_19] : memref<64x16xbf16, #tpu.memory_space<vmem>>, vector<64x16xbf16>
    %cst_20 = arith.constant dense<0.000000e+00> : vector<2x16xf32>
    %27 = tpu.matmul %25, %26, %cst_20 {dimension_numbers = #tpu.dot_dimension_numbers<[1], [0], [0], [1], [0, 0, 1, 1], [], []>} : vector<2x64xbf16>, vector<64x16xbf16>, vector<2x16xf32> -> vector<2x16xf32>
    %c0_21 = arith.constant 0 : index
    %c0_22 = arith.constant 0 : index
    %28 = vector.load %arg9[%c0_21, %c0_22] : memref<1x16xf32, #tpu.memory_space<vmem>>, vector<1x16xf32>
    %29 = vector.broadcast %28 : vector<1x16xf32> to vector<2x16xf32>
    %30 = arith.addf %27, %29 : vector<2x16xf32>
    %c0_23 = arith.constant 0 : index
    %c0_24 = arith.constant 0 : index
    %31 = vector.load %arg10[%c0_23, %c0_24] : memref<2x16xf32, #tpu.memory_space<vmem>>, vector<2x16xf32>
    tpu.vector_store %arg10[%c0_23, %c0_24], %30 {strides = array<i32>} : memref<2x16xf32, #tpu.memory_space<vmem>>, vector<2x16xf32>,
    return
  }
  func.func @transform_0(%arg0: i32) -> (i32, i32) {
    %c0_i32 = arith.constant 0 : i32
    %c0_i32_0 = arith.constant 0 : i32
    return %arg0, %c0_i32 : i32, i32
  }
  func.func @transform_1(%arg0: i32) -> (i32, i32) {
    %c0_i32 = arith.constant 0 : i32
    %c0_i32_0 = arith.constant 0 : i32
    %c0_i32_1 = arith.constant 0 : i32
    return %c0_i32, %c0_i32_0 : i32, i32
  }
  func.func @transform_2(%arg0: i32) -> (i32, i32) {
    %c0_i32 = arith.constant 0 : i32
    %c0_i32_0 = arith.constant 0 : i32
    %c0_i32_1 = arith.constant 0 : i32
    return %c0_i32, %c0_i32_0 : i32, i32
  }
  func.func @transform_3(%arg0: i32) -> (i32, i32) {
    %c0_i32 = arith.constant 0 : i32
    %c0_i32_0 = arith.constant 0 : i32
    %c0_i32_1 = arith.constant 0 : i32
    return %c0_i32, %c0_i32_0 : i32, i32
  }
  func.func @transform_4(%arg0: i32) -> (i32, i32) {
    %c0_i32 = arith.constant 0 : i32
    %c0_i32_0 = arith.constant 0 : i32
    %c0_i32_1 = arith.constant 0 : i32
    return %c0_i32, %c0_i32_0 : i32, i32
  }
  func.func @transform_5(%arg0: i32) -> (i32, i32) {
    %c0_i32 = arith.constant 0 : i32
    %c0_i32_0 = arith.constant 0 : i32
    %c0_i32_1 = arith.constant 0 : i32
    return %c0_i32, %c0_i32_0 : i32, i32
  }
  func.func @transform_6(%arg0: i32) -> (i32, i32) {
    %c0_i32 = arith.constant 0 : i32
    %c0_i32_0 = arith.constant 0 : i32
    %c0_i32_1 = arith.constant 0 : i32
    return %c0_i32, %c0_i32_0 : i32, i32
  }
  func.func @transform_7(%arg0: i32) -> (i32, i32) {
    %c0_i32 = arith.constant 0 : i32
    %c0_i32_0 = arith.constant 0 : i32
    %c0_i32_1 = arith.constant 0 : i32
    return %c0_i32, %c0_i32_0 : i32, i32
  }
  func.func @transform_8(%arg0: i32) -> (i32, i32) {
    %c0_i32 = arith.constant 0 : i32
    %c0_i32_0 = arith.constant 0 : i32
    %c0_i32_1 = arith.constant 0 : i32
    return %c0_i32, %c0_i32_0 : i32, i32
  }
  func.func @transform_9(%arg0: i32) -> (i32, i32) {
    %c0_i32 = arith.constant 0 : i32
    %c0_i32_0 = arith.constant 0 : i32
    return %arg0, %c0_i32 : i32, i32
  }
}

</mosaic_0001>

<bundles_post_ra>
// kernel: tpu_custom_call.1
= control target key start
LH: loop header
LB: loop body
LE: loop exit
PB: predicated region body
PF: predicated region fallthrough
CT: control target
= control target key end

     0   :  { %v545_v1 = vmov 0.0   ;;  %vm546_vm0 = vmmov 0   ;;  %vm59_vm1 = vcmask 261120   ;;  %s707_s0 = inlined_call_operand.vmem [shape: f32[2,32], index: 0, kind: input, shape index: {}]   ;;  %s708_s1 = inlined_call_operand.vmem [shape: bf16[32,64], index: 1, kind: input, shape index: {}]   ;;  %s709_s2 = inlined_call_operand.vmem [shape: f32[1,64], index: 2, kind: input, shape index: {}]   ;;  %s710_s3 = inlined_call_operand.vmem [shape: bf16[64,128], index: 3, kind: input, shape index: {}]   ;;  %s711_s4 = inlined_call_operand.vmem [shape: f32[1,128], index: 4, kind: input, shape index: {}]   ;;  %s712_s5 = inlined_call_operand.vmem [shape: bf16[128,64], index: 5, kind: input, shape index: {}]   ;;  %s713_s6 = inlined_call_operand.vmem [shape: f32[1,64], index: 6, kind: input, shape index: {}]   ;;  %s714_s7 = inlined_call_operand.vmem [shape: bf16[64,16], index: 7, kind: input, shape index: {}]   ;;  %s715_s8 = inlined_call_operand.vmem [shape: f32[1,16], index: 8, kind: input, shape index: {}]   ;;  %s716_s9 = inlined_call_operand.hbm [shape: f32[2,16], index: 9, kind: output, shape index: {}]  }
   0x1   :  { %v503_v0 = vld [vmem:[%s708_s1] sm:$0xff]   ;;  %448 = vmatprep.subr.bf16.mxu0 %v545_v1  ;;  %v504_v2 = vld [vmem:[%s708_s1 + $0x8] sm:$0xff]   ;;  %456 = vmatprep.subr.bf16.mxu1 %v545_v1 }
   0x2   :  { %449 = vmatpush3.bf16.msra.mxu0 %v503_v0  ;;  %452 = vmatprep.mubr.msk.bf16.mxu0 %vm546_vm0, %v545_v1  ;;  %v34_v3 = vld [vmem:[%s707_s0] sm:$0x3]  ;;  %v506_v5 = vld [vmem:[%s710_s3 + $0x8] sm:$0xff]  }
   0x3   :  { %v505_v4 = vld [vmem:[%s710_s3] sm:$0xff]   ;;  %450 = vmatprep.subr.bf16.mxu0 %v545_v1  ;;  %464 = vmatprep.mubr.msk.bf16.mxu1 %vm546_vm0, %v545_v1  ;;  %v35_v6 = vpack.c.bf16 %v34_v3, %v34_v3 }
   0x4   :  { %457 = vmatpush3.bf16.msra.mxu1 %v505_v4 }
   0x5   :  { %458 = vmatprep.subr.bf16.mxu1 %v545_v1 }
   0x6   :  { %451 = vmatpush3.bf16.msra.mxu0 %v504_v2 }
   0x7   :  { %468 = vmatprep.subr.bf16.mxu0 %v545_v1 }
   0x8   :  { %459 = vmatpush3.bf16.msra.mxu1 %v506_v5 }
   0x9   :  { %453 = vmatmul.mubr.msk.bf16.vlgmr.msra.gmra.mrb[0].mxu0 %vm59_vm1, %v35_v6  ;;  %460 = vmatprep.subr.bf16.mxu1 %v545_v1 }
   0xa   :  { %484 = vmatprep.mubr.msk.bf16.mxu0 %vm546_vm0, %v545_v1 }
   0xb   :  { %14 = vsyncpa [#allocation3], 0  ;;  %v507_v7 = vld [vmem:[%s710_s3 + $0x10] sm:$0xff]   ;;  %v508_v8 = vld [vmem:[%s710_s3 + $0x18] sm:$0xff]   ;;  %vm144_vm2 = vcmask 523264   ;;  %s547_s26 = smov [#allocation2]  }
   0xc   :  { %461 = vmatpush3.bf16.msra.mxu1 %v507_v7  ;;  %v509_v9 = vld [vmem:[%s712_s5] sm:$0xff]   ;;  %v510_v10 = vld [vmem:[%s712_s5 + $0x8] sm:$0xff]   ;;  %v511_v11 = vld [vmem:[%s712_s5 + $0x10] sm:$0xff]   ;;  %vm385_vm3 = vcmask 123904  }
   0xd   :  { %462 = vmatprep.subr.bf16.mxu1 %v545_v1  ;;  %469 = vmatpush3.bf16.msra.mxu0 %v509_v9  ;;  %v512_v12 = vld [vmem:[%s712_s5 + $0x18] sm:$0xff]   ;;  %v513_v13 = vld [vmem:[%s712_s5 + $0x20] sm:$0xff]   ;;  %v514_v14 = vld [vmem:[%s712_s5 + $0x28] sm:$0xff]  }
   0xe   :  { %470 = vmatprep.subr.bf16.mxu0 %v545_v1  ;;  %v401_v15 = vld [vmem:[%s709_s2] ss:$0 sm:$0xff]  ;;  %v515_v23 = vld [vmem:[%s712_s5 + $0x30] sm:$0xff]   ;;  %v516_v24 = vld [vmem:[%s712_s5 + $0x38] sm:$0xff]  }
   0xf   :  { %v517_v25 = vld [vmem:[%s714_s7] sm:$0xff]   ;;  %v518_v26 = vld [vmem:[%s714_s7 + $0x8] sm:$0xff]   ;;  %v519_v35 = vld [vmem:[%s714_s7 + $0x10] sm:$0xff]  }
  0x10   :  { %463 = vmatpush3.bf16.msra.mxu1 %v508_v8  ;;  %v405_v27 = vld [vmem:[%s711_s4] ss:$0 sm:$0xff]  ;;  %v520_v36 = vld [vmem:[%s714_s7 + $0x18] sm:$0xff]   ;;  %s393_s7 = sshll.u32 %s547_s26, 4  ;;  %s394_s7 = int_to_ptr.vmem [resolvable:$true] %s393_s7 }
  0x11   :  { %488 = vmatprep.subr.bf16.mxu1 %v545_v1  ;;  %471 = vmatpush3.bf16.msra.mxu0 %v510_v10  ;;  %v411_v37 = vld [vmem:[%s713_s6] ss:$0 sm:$0xff]  ;;  %s521_s6 = scalar_lea.vmem %s394_s7, 32  ;;  %p526_p1 = scmp.lt.s32.totalorder %s394_s7, %s394_s7 }
  0x12   :  { %472 = vmatprep.subr.bf16.mxu0 %v545_v1  ;;  %v420_v45 = vld [vmem:[%s715_s8] ss:$0 sm:$0xff]  ;;  %p522_p0 = scmp.ne.s32.totalorder %s394_s7, %s521_s6  ;;  %p527_p2 = scmp.lt.s32.totalorder %s521_s6, %s521_s6 }
  0x14   :  { %p528_p3 = por %p527_p2, %p526_p1 }
  0x15   :  { %473 = vmatpush3.bf16.msra.mxu0 %v511_v11 }
  0x16   :  { %474 = vmatprep.subr.bf16.mxu0 %v545_v1  ;;  %p529_p4 = pnand %p528_p3, %p522_p0 }
  0x19   :  { %475 = vmatpush3.bf16.msra.mxu0 %v512_v12 }
  0x1a   :  { %476 = vmatprep.subr.bf16.mxu0 %v545_v1 }
  0x1d   :  { %477 = vmatpush3.bf16.msra.mxu0 %v513_v13 }
  0x1e   :  { %478 = vmatprep.subr.bf16.mxu0 %v545_v1 }
  0x21   :  { %479 = vmatpush3.bf16.msra.mxu0 %v514_v14 }
  0x22   :  { %480 = vmatprep.subr.bf16.mxu0 %v545_v1 }
  0x25   :  { %481 = vmatpush3.bf16.msra.mxu0 %v515_v23 }
  0x26   :  { %482 = vmatprep.subr.bf16.mxu0 %v545_v1 }
  0x29   :  { %483 = vmatpush3.bf16.msra.mxu0 %v516_v24 }
  0xdc   :  { %v97_v16 = vpop.f32.mrb[0].mxu0 }
  0xdd   :  { %v98_v17 = vadd.f32 %v401_v15, %v97_v16  ;;  %v454_v18 = vpop.f32.mrb[1].mxu0 }
  0xde   :  { %v100_v19 = vpop.f32.mrb[2].mxu0 }
  0xdf   :  { %v103_v20 = vmax.f32 %v98_v17, 0.0  ;;  %v455_v21 = vpop.f32.mrb[3].mxu0 }
  0xe1   :  { %v104_v22 = vpack.c.bf16 %v103_v20, %v103_v20 }
  0xe3   :  { %465 = vmatmul.mubr.msk.bf16.vlgmr.msra.gmra.mrb[0].mxu1 %vm144_vm2, %v104_v22 }
  0xe4   :  { %496 = vmatprep.mubr.msk.bf16.mxu1 %vm546_vm0, %v545_v1  ;;  %489 = vmatpush3.bf16.msra.mxu1 %v517_v25 }
  0xe5   :  { %490 = vmatprep.subr.bf16.mxu1 %v545_v1 }
  0xe8   :  { %491 = vmatpush3.bf16.msra.mxu1 %v518_v26 }
  0xe9   :  { %492 = vmatprep.subr.bf16.mxu1 %v545_v1 }
  0xec   :  { %493 = vmatpush3.bf16.msra.mxu1 %v519_v35 }
  0xed   :  { %494 = vmatprep.subr.bf16.mxu1 %v545_v1 }
  0xf0   :  { %495 = vmatpush3.bf16.msra.mxu1 %v520_v36 }
 0x1b6   :  { %v182_v28 = vpop.f32.mrb[0].mxu1 }
 0x1b7   :  { %v183_v29 = vadd.f32 %v405_v27, %v182_v28  ;;  %v466_v30 = vpop.f32.mrb[1].mxu1 }
 0x1b8   :  { %v185_v31 = vpop.f32.mrb[2].mxu1 }
 0x1b9   :  { %v188_v32 = vmax.f32 %v183_v29, 0.0  ;;  %v467_v33 = vpop.f32.mrb[3].mxu1 }
 0x1bb   :  { %v189_v34 = vpack.c.bf16 %v188_v32, %v188_v32 }
 0x1bd   :  { %485 = vmatmul.mubr.bf16.vlgmr.msra.gmra.mrb[4].mxu0 %v189_v34 }
 0x290   :  { %v295_v38 = vpop.f32.mrb[4].mxu0 }
 0x291   :  { %v296_v39 = vadd.f32 %v411_v37, %v295_v38  ;;  %v486_v40 = vpop.f32.mrb[5].mxu0 }
 0x292   :  { %v298_v41 = vpop.f32.mrb[6].mxu0 }
 0x293   :  { %v301_v42 = vmax.f32 %v296_v39, 0.0  ;;  %v487_v43 = vpop.f32.mrb[7].mxu0 }
 0x295   :  { %v302_v44 = vpack.c.bf16 %v301_v42, %v301_v42 }
 0x297   :  { %497 = vmatmul.mubr.msk.bf16.vlgmr.msra.gmra.mrb[4].mxu1 %vm144_vm2, %v302_v44 }
 0x36a   :  { %v379_v46 = vpop.f32.mrb[4].mxu1 }
 0x36b   :  { %v380_v47 = vadd.f32 %v420_v45, %v379_v46  ;;  %v498_v48 = vpop.f32.mrb[5].mxu1 }
 0x36c   :  { %v382_v49 = vpop.f32.mrb[6].mxu1 }
 0x36d   :  { %v499_v50 = vpop.f32.mrb[7].mxu1  ;;  %386 = vst.msk [vmem:[#allocation2] sm:$0x3] %vm385_vm3, %v380_v47 }
 0x36e   :  { %532 = shalt.err (!%p529_p4)
}
 0x36f   :  { %s533_s8 = scalar_lea.hbm %s716_s9, 32 }
 0x370   :  { %p534_p5 = scmp.ne.s32.totalorder %s716_s9, %s533_s8  ;;  %p537_p6 = scmp.lt.u32.totalorder %s533_s8, %s716_s9 }
 0x372   :  { %p539_p7 = pnand %p537_p6, %p534_p5 }
 0x374   :  { %542 = shalt.err (!%p539_p7)
}
 0x375   :  { %396 = dma.vmem_to_hbm [thread:$0]  %s394_s7, 32, %s716_s9, [#allocation3]  }
 0x376   :  { %543 = dma.done.wait [#allocation3], 32  }
 0x377   :  { %544 = vsyncadd [#allocation3], 4294967264 }
 0x378   :  { %400 = vsyncpa [#allocation3], 1 }

</bundles_post_ra>
